<compile_context>
chip_gen: v7x
topology: tpu7x:2x2x1
jax: 0.10.0
libtpu: 0.0.40
codegen_flags: <defaults>
</compile_context>

<pallas_src>
import jax
import jax.numpy as jnp
from jax.experimental import pallas as pl
from jax.experimental.pallas import tpu as pltpu


def _linear_kernel(x_ref, w_ref, b_ref, o_ref):
    # x_ref: (F, TB)  feature on sublanes, batch on lanes (lane-dense)
    # w_ref: (F, 1)   resident in VMEM, broadcast over lanes
    # b_ref: (1,)     scalar in SMEM
    # o_ref: (1, TB)  lane-dense output row
    x = x_ref[...]
    w = w_ref[...]
    # VPU multiply + sublane reduction (no MXU involvement).
    y = jnp.sum(x * w, axis=0, keepdims=True)      # (1, TB) f32
    o_ref[...] = y + b_ref[0]


def linear_net_forward(x, weight, bias, *, max_tile_b=2048):
    """x: (B, F) f32, weight: (1, F) f32 (PyTorch layout), bias: (1,) f32.

    Returns y of shape (B, 1), matching nn.Linear(n_feature, 1).
    """
    B, F = x.shape
    x = x.astype(jnp.float32)

    # Lane-dense presentation: batch on the lane axis.
    x_t = x.T                                           # (F, B)
    w_col = weight.reshape(F, 1).astype(jnp.float32)    # (F, 1)
    b = bias.reshape(1).astype(jnp.float32)             # (1,) scalar for SMEM

    # Batch tile: multiple of 128 lanes, capped to keep VMEM tiny even on
    # v7x (64 MiB physical).  F * TB * 4 B * 2 (double-buffer) stays << 1 MiB.
    b_128 = ((B + 127) // 128) * 128
    tb = min(max_tile_b, b_128)
    b_pad = ((b_128 + tb - 1) // tb) * tb
    if b_pad != B:
        x_t = jnp.pad(x_t, ((0, 0), (0, b_pad - B)))
    num_tiles = b_pad // tb

    y_row = pl.pallas_call(
        _linear_kernel,
        out_shape=jax.ShapeDtypeStruct((1, b_pad), jnp.float32),
        grid_spec=pltpu.PrefetchScalarGridSpec(
            num_scalar_prefetch=0,
            grid=(num_tiles,),
            in_specs=[
                # x tiles streamed over the batch (lane) axis.
                pl.BlockSpec((F, tb), lambda i: (0, i)),
                # weight stays resident in VMEM across all grid steps.
                pl.BlockSpec((F, 1), lambda i: (0, 0)),
                # bias: single scalar in SMEM (no padded VMEM tile).
                pl.BlockSpec(memory_space=pltpu.MemorySpace.SMEM),
            ],
            out_specs=pl.BlockSpec((1, tb), lambda i: (0, i)),
        ),
        compiler_params=pltpu.CompilerParams(
            dimension_semantics=("parallel",),
        ),
    )(x_t, w_col, b)

    # Strip padding and restore the (B, 1) nn.Linear output shape.
    return y_row[0, :B].reshape(B, 1)


if __name__ == "__main__":
    n_feature = 8
    batch = 16

    key = jax.random.PRNGKey(0)
    kx, kw, kb = jax.random.split(key, 3)

    # Deterministic synthetic inputs/params (mirrors nn.Linear shapes).
    x = jax.random.normal(kx, (batch, n_feature), dtype=jnp.float32)
    weight = jax.random.normal(kw, (1, n_feature), dtype=jnp.float32) * 0.1
    bias = jax.random.normal(kb, (1,), dtype=jnp.float32) * 0.1

    y = linear_net_forward(x, weight, bias)
    y = jax.block_until_ready(y)

    # Reference check against plain JAX.
    y_ref = x @ weight.T + bias
    assert y.shape == (batch, 1)
    assert jnp.allclose(y, y_ref, atol=1e-5), "mismatch vs reference"

    print("KERNEL_OK")
</pallas_src>

<mosaic_0001>
module attributes {stable_mosaic.version = 11 : i64} {
  func.func @_linear_kernel(%arg0: i32, %arg1: memref<8x128xf32, #tpu.memory_space<vmem>>, %arg2: memref<8x1xf32, #tpu.memory_space<vmem>>, %arg3: memref<1xf32, #tpu.memory_space<smem>>, %arg4: memref<1x128xf32, #tpu.memory_space<vmem>>) attributes {dimension_semantics = [#tpu.dimension_semantics<parallel>], iteration_bounds = array<i64: 1>, scalar_prefetch = 0 : i64, scratch_operands = 0 : i64, tpu.core_type = #tpu.core_type<tc>, window_params = [{transform_indices = @transform_0, window_bounds = array<i64: 8, 128>}, {pipeline_mode = #tpu.pipeline_mode<synchronous>, transform_indices = @transform_1, window_bounds = array<i64: 8, 1>}, {transform_indices = @transform_2, window_bounds = array<i64: 1>}, {transform_indices = @transform_3, window_bounds = array<i64: 1, 128>}]} {
    %c0 = arith.constant 0 : index
    %c0_0 = arith.constant 0 : index
    %0 = vector.load %arg1[%c0, %c0_0] : memref<8x128xf32, #tpu.memory_space<vmem>>, vector<8x128xf32>
    %c0_1 = arith.constant 0 : index
    %c0_2 = arith.constant 0 : index
    %1 = vector.load %arg2[%c0_1, %c0_2] : memref<8x1xf32, #tpu.memory_space<vmem>>, vector<8x1xf32>
    %2 = vector.broadcast %1 : vector<8x1xf32> to vector<8x128xf32>
    %3 = arith.mulf %0, %2 : vector<8x128xf32>
    %cst = arith.constant dense<0.000000e+00> : vector<128xf32>
    %4 = vector.multi_reduction <add>, %3, %cst [0] : vector<8x128xf32> to vector<128xf32>
    %5 = vector.shape_cast %4 : vector<128xf32> to vector<1x128xf32>
    %c0_3 = arith.constant 0 : index
    %6 = memref.load %arg3[%c0_3] : memref<1xf32, #tpu.memory_space<smem>>
    %7 = vector.broadcast %6 : f32 to vector<1x128xf32>
    %8 = arith.addf %5, %7 : vector<1x128xf32>
    %c0_4 = arith.constant 0 : index
    %c0_5 = arith.constant 0 : index
    %9 = vector.load %arg4[%c0_4, %c0_5] : memref<1x128xf32, #tpu.memory_space<vmem>>, vector<1x128xf32>
    tpu.vector_store %arg4[%c0_4, %c0_5], %8 {strides = array<i32>} : memref<1x128xf32, #tpu.memory_space<vmem>>, vector<1x128xf32>,
    return
  }
  func.func @transform_0(%arg0: i32) -> (i32, i32) {
    %c0_i32 = arith.constant 0 : i32
    %c0_i32_0 = arith.constant 0 : i32
    return %c0_i32, %arg0 : i32, i32
  }
  func.func @transform_1(%arg0: i32) -> (i32, i32) {
    %c0_i32 = arith.constant 0 : i32
    %c0_i32_0 = arith.constant 0 : i32
    %c0_i32_1 = arith.constant 0 : i32
    return %c0_i32, %c0_i32_0 : i32, i32
  }
  func.func @transform_2(%arg0: i32) -> i32 {
    %c0_i32 = arith.constant 0 : i32
    %c0_i32_0 = arith.constant 0 : i32
    return %c0_i32 : i32
  }
  func.func @transform_3(%arg0: i32) -> (i32, i32) {
    %c0_i32 = arith.constant 0 : i32
    %c0_i32_0 = arith.constant 0 : i32
    return %c0_i32, %arg0 : i32, i32
  }
}

</mosaic_0001>

<bundles_post_ra>
// kernel: tpu_custom_call.1
= control target key start
LH: loop header
LB: loop body
LE: loop exit
PB: predicated region body
PF: predicated region fallthrough
CT: control target
= control target key end

     0   :  { %s118_s0 = inlined_call_operand.vmem [shape: f32[8,128], index: 0, kind: input, shape index: {}]   ;;  %s119_s1 = inlined_call_operand.vmem [shape: f32[8,1], index: 1, kind: input, shape index: {}]   ;;  %s120_s2 = inlined_call_operand.<no memory space> [shape: f32[1], index: 2, kind: input, shape index: {}]   ;;  %s121_s3 = inlined_call_operand.hbm [shape: f32[1,128], index: 3, kind: output, shape index: {}]  }
   0x1   :  { %v17_v0 = vld [vmem:[%s119_s1] sm:$0xff] }
   0x2   :  { %9 = vsyncpa [#allocation4], 0  ;;  %v75_v1 = vmov 0   ;;  %v16_v2 = vld [vmem:[%s118_s0] sm:$0xff]  ;;  %v31_v10 = vstv %s120_s2  ;;  %s76_s1 = smov [#allocation3]  }
   0x3   :  { %50 = vset.pattern.permute.xlu0 %v75_v1  ;;  %s40_s18 = sshll.u32 %s76_s1, 4  ;;  %s41_s18 = int_to_ptr.vmem [resolvable:$true] %s40_s18 }
   0x4   :  { %20 = vperm.xlu0 %50, %v17_v0   ;;  %s51_s19 = scalar_lea.vmem %s41_s18, 16  ;;  %s55_s0 = scalar_lea.vmem %s41_s18, 32 }
   0x5   :  { %p52_p0 = scmp.ne.s32.totalorder %s41_s18, %s51_s19  ;;  %p56_p1 = scmp.lt.s32.totalorder %s41_s18, %s41_s18 }
   0x6   :  { %p57_p2 = scmp.lt.s32.totalorder %s55_s0, %s51_s19 }
   0x8   :  { %p58_p3 = por %p57_p2, %p56_p1 }
   0xa   :  { %p59_p4 = pnand %p58_p3, %p52_p0 }
  0x83   :  { %v21_v3 = vpop.permute.xlu0 %20 }
  0x84   :  { %v23_v4 = vmul.f32 %v21_v3, %v16_v2 }
  0x86   :  { %v24_v5 = vrot.slane %v23_v4, 4 }
  0x88   :  { %v25_v6 = vadd.f32 %v24_v5, %v23_v4 }
  0x8a   :  { %v26_v7 = vrot.slane %v25_v6, 2 }
  0x8c   :  { %v27_v8 = vadd.f32 %v26_v7, %v25_v6 }
  0x8e   :  { %v28_v9 = vrot.slane %v27_v8, 1 }
  0x90   :  { %v29_v11 = vadd.f32 %v28_v9, %v27_v8 }
  0x92   :  { %v32_v12 = vadd.f32 %v31_v10, %v29_v11 }
  0x94   :  { %33 = vst [vmem:[#allocation3] sm:$0x1] %v32_v12 }
  0x95   :  { %62 = shalt.err (!%p59_p4)
}
  0x96   :  { %s63_s22 = scalar_lea.hbm %s121_s3, 16 }
  0x97   :  { %p64_p5 = scmp.ne.s32.totalorder %s121_s3, %s63_s22  ;;  %p67_p6 = scmp.lt.u32.totalorder %s63_s22, %s121_s3 }
  0x99   :  { %p69_p7 = pnand %p67_p6, %p64_p5 }
  0x9b   :  { %72 = shalt.err (!%p69_p7)
}
  0x9c   :  { %43 = dma.vmem_to_hbm [thread:$0]  %s41_s18, 16, %s121_s3, [#allocation4]  }
  0x9d   :  { %73 = dma.done.wait [#allocation4], 16  }
  0x9e   :  { %74 = vsyncadd [#allocation4], 4294967280 }
  0x9f   :  { %47 = vsyncpa [#allocation4], 1 }

</bundles_post_ra>
